<compile_context>
chip_gen: v5e
topology: v5e:2x2
jax: 0.10.0
libtpu: 0.0.40
codegen_flags: <defaults>
</compile_context>

<pallas_src>
import jax
import jax.numpy as jnp
from jax.experimental import pallas as pl
from jax.experimental.pallas import tpu as pltpu


def _rfeat_kernel(x_ref, w1_ref, b1_ref, w2_ref, b2_ref, o_ref):
    # Two MXU matmuls with f32 accumulation; bias-add / ReLU on the VPU in f32.
    h = jnp.dot(x_ref[...], w1_ref[...], preferred_element_type=jnp.float32)
    h = jnp.maximum(h + b1_ref[...], 0.0)                    # f32 VPU math
    # Feed the second MXU pass in the weight dtype (bf16 when compute_dtype=bf16),
    # accumulate in f32.
    y = jnp.dot(h.astype(w2_ref.dtype), w2_ref[...],
                preferred_element_type=jnp.float32)
    y = jnp.maximum(y + b2_ref[...], 0.0)
    o_ref[...] = y.astype(o_ref.dtype)


def _round_up(n, m):
    return ((n + m - 1) // m) * m


def _pad_to(a, shape):
    pads = [(0, s - d) for d, s in zip(a.shape, shape)]
    if any(p[1] for p in pads):
        a = jnp.pad(a, pads)
    return a


def _build_call(tile_b, Bp, D_in_p, D_out_p, out_dtype, vmem_limit, weight_mode):
    """Build the pallas_call. weight_mode=None or pl.Buffered(1) for resident weights."""
    wkw = {} if weight_mode is None else {"pipeline_mode": weight_mode}
    grid = (Bp // tile_b,)
    return pl.pallas_call(
        _rfeat_kernel,
        out_shape=jax.ShapeDtypeStruct((Bp, D_out_p), out_dtype),
        grid_spec=pltpu.PrefetchScalarGridSpec(
            num_scalar_prefetch=0,
            grid=grid,
            in_specs=[
                pl.BlockSpec((tile_b, D_in_p), lambda i: (i, 0)),          # x tile (pipelined)
                pl.BlockSpec((D_in_p, D_in_p), lambda i: (0, 0), **wkw),   # W1 resident
                pl.BlockSpec((1, D_in_p), lambda i: (0, 0), **wkw),        # b1 (f32)
                pl.BlockSpec((D_in_p, D_out_p), lambda i: (0, 0), **wkw),  # W2 resident
                pl.BlockSpec((1, D_out_p), lambda i: (0, 0), **wkw),       # b2 (f32)
            ],
            out_specs=pl.BlockSpec((tile_b, D_out_p), lambda i: (i, 0)),
        ),
        compiler_params=pltpu.CompilerParams(
            dimension_semantics=("parallel",),   # batch axis shardable across TCs (v7x)
            vmem_limit_bytes=vmem_limit,
        ),
    )


def rfeat_forward(x, w1, b1, w2, b2, *, tile_b=512, compute_dtype=None, out_dtype=None):
    """x: (B, D_in); w1: (D_in, D_in); b1: (D_in,); w2: (D_in, D_out); b2: (D_out,).

    Weights are stored pre-transposed relative to nn.Linear (kernel does x @ W).
    compute_dtype: dtype of the MXU operands (e.g. jnp.bfloat16); accumulation is f32.
    """
    B, D_in = x.shape
    D_out = w2.shape[1]
    if compute_dtype is None:
        compute_dtype = x.dtype
    if out_dtype is None:
        out_dtype = x.dtype

    # Lane-dense feature dims: multiples of 128 (full MXU width, unmasked stores).
    D_in_p = _round_up(D_in, 128)
    D_out_p = _round_up(D_out, 128)

    # Batch tile: multiple of 8 sublanes, capped by the (padded) batch, so the grid
    # has many steps for DMA/compute overlap and megacore sharding.  Pad ragged B.
    tile_b = max(8, _round_up(min(tile_b, _round_up(B, 8)), 8))
    Bp = _round_up(B, tile_b)

    x_p = _pad_to(x, (Bp, D_in_p)).astype(compute_dtype)
    w1_p = _pad_to(w1, (D_in_p, D_in_p)).astype(compute_dtype)
    w2_p = _pad_to(w2, (D_in_p, D_out_p)).astype(compute_dtype)
    b1_p = _pad_to(b1.reshape(1, D_in), (1, D_in_p)).astype(jnp.float32)
    b2_p = _pad_to(b2.reshape(1, D_out), (1, D_out_p)).astype(jnp.float32)

    # Explicit VMEM budget (counts double-buffered weights so the fallback also fits).
    isz = jnp.dtype(compute_dtype).itemsize
    osz = jnp.dtype(out_dtype).itemsize
    vmem_bytes = int(
        2 * tile_b * D_in_p * isz                          # x tile, double buffered
        + 2 * tile_b * D_out_p * osz                       # out tile, double buffered
        + 2 * (D_in_p * D_in_p + D_in_p * D_out_p) * isz   # weights (worst case 2 bufs)
        + 2 * (D_in_p + D_out_p) * 4                       # biases (f32)
        + tile_b * (D_in_p + D_out_p) * 4                  # live f32 intermediates
        + (2 << 20)                                        # margin
    )
    # Cap at 64 MiB so the request also fits v7x's physical VMEM.
    vmem_limit = int(min(max(vmem_bytes, 16 << 20), 64 << 20))

    args = (x_p, w1_p, b1_p, w2_p, b2_p)
    try:
        # Single-buffer the resident weights (constant index_map, never re-fetched).
        call = _build_call(tile_b, Bp, D_in_p, D_out_p, out_dtype, vmem_limit,
                           pl.Buffered(1))
        out_p = call(*args)
    except Exception:
        # Fallback for jax versions where pipeline_mode isn't supported on TPU specs.
        call = _build_call(tile_b, Bp, D_in_p, D_out_p, out_dtype, vmem_limit, None)
        out_p = call(*args)

    return out_p[:B, :D_out]


def _reference(x, w1, b1, w2, b2, compute_dtype=jnp.float32):
    cd = compute_dtype
    h = jnp.dot(x.astype(cd), w1.astype(cd), preferred_element_type=jnp.float32) + b1
    h = jnp.maximum(h, 0.0)
    y = jnp.dot(h.astype(cd), w2.astype(cd), preferred_element_type=jnp.float32) + b2
    return jnp.maximum(y, 0.0)


if __name__ == "__main__":
    key = jax.random.PRNGKey(0)

    # --- Test 1: exact f32 path at the module's natural (tiny) size. ---
    # At this size the kernel is launch-overhead dominated; it exists to
    # validate correctness.  Real use should batch many rows (see Test 2).
    B, D_in, D_out = 8, 32, 16
    kx, kw1, kb1, kw2, kb2 = jax.random.split(key, 5)
    lim1 = 1.0 / jnp.sqrt(D_in)
    x = jax.random.normal(kx, (B, D_in), dtype=jnp.float32)
    w1 = jax.random.uniform(kw1, (D_in, D_in), jnp.float32, -lim1, lim1)
    b1 = jax.random.uniform(kb1, (D_in,), jnp.float32, -lim1, lim1)
    w2 = jax.random.uniform(kw2, (D_in, D_out), jnp.float32, -lim1, lim1)
    b2 = jax.random.uniform(kb2, (D_out,), jnp.float32, -lim1, lim1)

    out = jax.block_until_ready(rfeat_forward(x, w1, b1, w2, b2))
    ref = _reference(x, w1, b1, w2, b2)
    assert out.shape == (B, D_out)
    assert jnp.allclose(out, ref, atol=1e-5, rtol=1e-5), "f32 mismatch vs reference"

    # --- Test 2: bf16-operand / f32-accumulate path with a multi-step batch grid
    #             (exercises tiling, lane padding, and megacore-shardable grid). ---
    B2, D_in2, D_out2 = 256, 96, 48
    k2 = jax.random.fold_in(key, 1)
    kx2, kw12, kb12, kw22, kb22 = jax.random.split(k2, 5)
    lim2 = 1.0 / jnp.sqrt(D_in2)
    x2 = jax.random.normal(kx2, (B2, D_in2), dtype=jnp.float32)
    w12 = jax.random.uniform(kw12, (D_in2, D_in2), jnp.float32, -lim2, lim2)
    b12 = jax.random.uniform(kb12, (D_in2,), jnp.float32, -lim2, lim2)
    w22 = jax.random.uniform(kw22, (D_in2, D_out2), jnp.float32, -lim2, lim2)
    b22 = jax.random.uniform(kb22, (D_out2,), jnp.float32, -lim2, lim2)

    out2 = jax.block_until_ready(
        rfeat_forward(x2, w12, b12, w22, b22, tile_b=128,
                      compute_dtype=jnp.bfloat16))
    ref2 = _reference(x2, w12, b12, w22, b22, compute_dtype=jnp.bfloat16)
    assert out2.shape == (B2, D_out2)
    assert jnp.allclose(out2, ref2.astype(out2.dtype), atol=3e-2, rtol=3e-2), \
        "bf16 mismatch vs reference"

    print("KERNEL_OK")
</pallas_src>

<mosaic_0001>
module attributes {stable_mosaic.version = 11 : i64} {
  func.func @_rfeat_kernel(%arg0: i32, %arg1: memref<8x128xf32, #tpu.memory_space<vmem>>, %arg2: memref<128x128xf32, #tpu.memory_space<vmem>>, %arg3: memref<1x128xf32, #tpu.memory_space<vmem>>, %arg4: memref<128x128xf32, #tpu.memory_space<vmem>>, %arg5: memref<1x128xf32, #tpu.memory_space<vmem>>, %arg6: memref<8x128xf32, #tpu.memory_space<vmem>>) attributes {dimension_semantics = [#tpu.dimension_semantics<parallel>], iteration_bounds = array<i64: 1>, scalar_prefetch = 0 : i64, scratch_operands = 0 : i64, tpu.core_type = #tpu.core_type<tc>, window_params = [{transform_indices = @transform_0, window_bounds = array<i64: 8, 128>}, {pipeline_mode = #tpu.pipeline_mode<synchronous>, transform_indices = @transform_1, window_bounds = array<i64: 128, 128>}, {pipeline_mode = #tpu.pipeline_mode<synchronous>, transform_indices = @transform_2, window_bounds = array<i64: 1, 128>}, {pipeline_mode = #tpu.pipeline_mode<synchronous>, transform_indices = @transform_3, window_bounds = array<i64: 128, 128>}, {pipeline_mode = #tpu.pipeline_mode<synchronous>, transform_indices = @transform_4, window_bounds = array<i64: 1, 128>}, {transform_indices = @transform_5, window_bounds = array<i64: 8, 128>}]} {
    %c0 = arith.constant 0 : index
    %c0_0 = arith.constant 0 : index
    %0 = vector.load %arg1[%c0, %c0_0] : memref<8x128xf32, #tpu.memory_space<vmem>>, vector<8x128xf32>
    %c0_1 = arith.constant 0 : index
    %c0_2 = arith.constant 0 : index
    %1 = vector.load %arg2[%c0_1, %c0_2] : memref<128x128xf32, #tpu.memory_space<vmem>>, vector<128x128xf32>
    %cst = arith.constant dense<0.000000e+00> : vector<8x128xf32>
    %2 = tpu.matmul %0, %1, %cst {dimension_numbers = #tpu.dot_dimension_numbers<[1], [0], [0], [1], [0, 0, 1, 1], [], []>} : vector<8x128xf32>, vector<128x128xf32>, vector<8x128xf32> -> vector<8x128xf32>
    %c0_3 = arith.constant 0 : index
    %c0_4 = arith.constant 0 : index
    %3 = vector.load %arg3[%c0_3, %c0_4] : memref<1x128xf32, #tpu.memory_space<vmem>>, vector<1x128xf32>
    %4 = vector.broadcast %3 : vector<1x128xf32> to vector<8x128xf32>
    %5 = arith.addf %2, %4 : vector<8x128xf32>
    %cst_5 = arith.constant 0.000000e+00 : f32
    %6 = vector.broadcast %cst_5 : f32 to vector<8x128xf32>
    %7 = arith.maximumf %5, %6 : vector<8x128xf32>
    %c0_6 = arith.constant 0 : index
    %c0_7 = arith.constant 0 : index
    %8 = vector.load %arg4[%c0_6, %c0_7] : memref<128x128xf32, #tpu.memory_space<vmem>>, vector<128x128xf32>
    %cst_8 = arith.constant dense<0.000000e+00> : vector<8x128xf32>
    %9 = tpu.matmul %7, %8, %cst_8 {dimension_numbers = #tpu.dot_dimension_numbers<[1], [0], [0], [1], [0, 0, 1, 1], [], []>} : vector<8x128xf32>, vector<128x128xf32>, vector<8x128xf32> -> vector<8x128xf32>
    %c0_9 = arith.constant 0 : index
    %c0_10 = arith.constant 0 : index
    %10 = vector.load %arg5[%c0_9, %c0_10] : memref<1x128xf32, #tpu.memory_space<vmem>>, vector<1x128xf32>
    %11 = vector.broadcast %10 : vector<1x128xf32> to vector<8x128xf32>
    %12 = arith.addf %9, %11 : vector<8x128xf32>
    %cst_11 = arith.constant 0.000000e+00 : f32
    %13 = vector.broadcast %cst_11 : f32 to vector<8x128xf32>
    %14 = arith.maximumf %12, %13 : vector<8x128xf32>
    %c0_12 = arith.constant 0 : index
    %c0_13 = arith.constant 0 : index
    %15 = vector.load %arg6[%c0_12, %c0_13] : memref<8x128xf32, #tpu.memory_space<vmem>>, vector<8x128xf32>
    tpu.vector_store %arg6[%c0_12, %c0_13], %14 {strides = array<i32>} : memref<8x128xf32, #tpu.memory_space<vmem>>, vector<8x128xf32>,
    return
  }
  func.func @transform_0(%arg0: i32) -> (i32, i32) {
    %c0_i32 = arith.constant 0 : i32
    %c0_i32_0 = arith.constant 0 : i32
    return %arg0, %c0_i32 : i32, i32
  }
  func.func @transform_1(%arg0: i32) -> (i32, i32) {
    %c0_i32 = arith.constant 0 : i32
    %c0_i32_0 = arith.constant 0 : i32
    %c0_i32_1 = arith.constant 0 : i32
    return %c0_i32, %c0_i32_0 : i32, i32
  }
  func.func @transform_2(%arg0: i32) -> (i32, i32) {
    %c0_i32 = arith.constant 0 : i32
    %c0_i32_0 = arith.constant 0 : i32
    %c0_i32_1 = arith.constant 0 : i32
    return %c0_i32, %c0_i32_0 : i32, i32
  }
  func.func @transform_3(%arg0: i32) -> (i32, i32) {
    %c0_i32 = arith.constant 0 : i32
    %c0_i32_0 = arith.constant 0 : i32
    %c0_i32_1 = arith.constant 0 : i32
    return %c0_i32, %c0_i32_0 : i32, i32
  }
  func.func @transform_4(%arg0: i32) -> (i32, i32) {
    %c0_i32 = arith.constant 0 : i32
    %c0_i32_0 = arith.constant 0 : i32
    %c0_i32_1 = arith.constant 0 : i32
    return %c0_i32, %c0_i32_0 : i32, i32
  }
  func.func @transform_5(%arg0: i32) -> (i32, i32) {
    %c0_i32 = arith.constant 0 : i32
    %c0_i32_0 = arith.constant 0 : i32
    return %arg0, %c0_i32 : i32, i32
  }
}

module attributes {stable_mosaic.version = 11 : i64} {
  func.func @_rfeat_kernel(%arg0: i32, %arg1: memref<8x128xf32, #tpu.memory_space<vmem>>, %arg2: memref<128x128xf32, #tpu.memory_space<vmem>>, %arg3: memref<1x128xf32, #tpu.memory_space<vmem>>, %arg4: memref<128x128xf32, #tpu.memory_space<vmem>>, %arg5: memref<1x128xf32, #tpu.memory_space<vmem>>, %arg6: memref<8x128xf32, #tpu.memory_space<vmem>>) attributes {dimension_semantics = [#tpu.dimension_semantics<parallel>], iteration_bounds = array<i64: 1>, scalar_prefetch = 0 : i64, scratch_operands = 0 : i64, tpu.core_type = #tpu.core_type<tc>, window_params = [{transform_indices = @transform_0, window_bounds = array<i64: 8, 128>}, {pipeline_mode = #tpu.pipeline_mode<synchronous>, transform_indices = @transform_1, window_bounds = array<i64: 128, 128>}, {pipeline_mode = #tpu.pipeline_mode<synchronous>, transform_indices = @transform_2, window_bounds = array<i64: 1, 128>}, {pipeline_mode = #tpu.pipeline_mode<synchronous>, transform_indices = @transform_3, window_bounds = array<i64: 128, 128>}, {pipeline_mode = #tpu.pipeline_mode<synchronous>, transform_indices = @transform_4, window_bounds = array<i64: 1, 128>}, {transform_indices = @transform_5, window_bounds = array<i64: 8, 128>}]} {
    %c0 = arith.constant 0 : index
    %c0_0 = arith.constant 0 : index
    %0 = vector.load %arg1[%c0, %c0_0] : memref<8x128xf32, #tpu.memory_space<vmem>>, vector<8x128xf32>
    %c0_1 = arith.constant 0 : index
    %c0_2 = arith.constant 0 : index
    %1 = vector.load %arg2[%c0_1, %c0_2] : memref<128x128xf32, #tpu.memory_space<vmem>>, vector<128x128xf32>
    %cst = arith.constant dense<0.000000e+00> : vector<8x128xf32>
    %2 = tpu.matmul %0, %1, %cst {dimension_numbers = #tpu.dot_dimension_numbers<[1], [0], [0], [1], [0, 0, 1, 1], [], []>} : vector<8x128xf32>, vector<128x128xf32>, vector<8x128xf32> -> vector<8x128xf32>
    %c0_3 = arith.constant 0 : index
    %c0_4 = arith.constant 0 : index
    %3 = vector.load %arg3[%c0_3, %c0_4] : memref<1x128xf32, #tpu.memory_space<vmem>>, vector<1x128xf32>
    %4 = vector.broadcast %3 : vector<1x128xf32> to vector<8x128xf32>
    %5 = arith.addf %2, %4 : vector<8x128xf32>
    %cst_5 = arith.constant 0.000000e+00 : f32
    %6 = vector.broadcast %cst_5 : f32 to vector<8x128xf32>
    %7 = arith.maximumf %5, %6 : vector<8x128xf32>
    %c0_6 = arith.constant 0 : index
    %c0_7 = arith.constant 0 : index
    %8 = vector.load %arg4[%c0_6, %c0_7] : memref<128x128xf32, #tpu.memory_space<vmem>>, vector<128x128xf32>
    %cst_8 = arith.constant dense<0.000000e+00> : vector<8x128xf32>
    %9 = tpu.matmul %7, %8, %cst_8 {dimension_numbers = #tpu.dot_dimension_numbers<[1], [0], [0], [1], [0, 0, 1, 1], [], []>} : vector<8x128xf32>, vector<128x128xf32>, vector<8x128xf32> -> vector<8x128xf32>
    %c0_9 = arith.constant 0 : index
    %c0_10 = arith.constant 0 : index
    %10 = vector.load %arg5[%c0_9, %c0_10] : memref<1x128xf32, #tpu.memory_space<vmem>>, vector<1x128xf32>
    %11 = vector.broadcast %10 : vector<1x128xf32> to vector<8x128xf32>
    %12 = arith.addf %9, %11 : vector<8x128xf32>
    %cst_11 = arith.constant 0.000000e+00 : f32
    %13 = vector.broadcast %cst_11 : f32 to vector<8x128xf32>
    %14 = arith.maximumf %12, %13 : vector<8x128xf32>
    %c0_12 = arith.constant 0 : index
    %c0_13 = arith.constant 0 : index
    %15 = vector.load %arg6[%c0_12, %c0_13] : memref<8x128xf32, #tpu.memory_space<vmem>>, vector<8x128xf32>
    tpu.vector_store %arg6[%c0_12, %c0_13], %14 {strides = array<i32>} : memref<8x128xf32, #tpu.memory_space<vmem>>, vector<8x128xf32>,
    return
  }
  func.func @transform_0(%arg0: i32) -> (i32, i32) {
    %c0_i32 = arith.constant 0 : i32
    %c0_i32_0 = arith.constant 0 : i32
    return %arg0, %c0_i32 : i32, i32
  }
  func.func @transform_1(%arg0: i32) -> (i32, i32) {
    %c0_i32 = arith.constant 0 : i32
    %c0_i32_0 = arith.constant 0 : i32
    %c0_i32_1 = arith.constant 0 : i32
    return %c0_i32, %c0_i32_0 : i32, i32
  }
  func.func @transform_2(%arg0: i32) -> (i32, i32) {
    %c0_i32 = arith.constant 0 : i32
    %c0_i32_0 = arith.constant 0 : i32
    %c0_i32_1 = arith.constant 0 : i32
    return %c0_i32, %c0_i32_0 : i32, i32
  }
  func.func @transform_3(%arg0: i32) -> (i32, i32) {
    %c0_i32 = arith.constant 0 : i32
    %c0_i32_0 = arith.constant 0 : i32
    %c0_i32_1 = arith.constant 0 : i32
    return %c0_i32, %c0_i32_0 : i32, i32
  }
  func.func @transform_4(%arg0: i32) -> (i32, i32) {
    %c0_i32 = arith.constant 0 : i32
    %c0_i32_0 = arith.constant 0 : i32
    %c0_i32_1 = arith.constant 0 : i32
    return %c0_i32, %c0_i32_0 : i32, i32
  }
  func.func @transform_5(%arg0: i32) -> (i32, i32) {
    %c0_i32 = arith.constant 0 : i32
    %c0_i32_0 = arith.constant 0 : i32
    return %arg0, %c0_i32 : i32, i32
  }
}

</mosaic_0001>

<bundles_post_ra>
// kernel: tpu_custom_call.1
= control target key start
LH: loop header
LB: loop body
LE: loop exit
PB: predicated region body
PF: predicated region fallthrough
CT: control target
= control target key end

     0   :  { %10 = vsyncpa [#allocation3], 0  ;;  %s332_s0 = inlined_call_operand.hbm [shape: f32[8,128], index: 0, kind: input, shape index: {}]   ;;  %s333_s1 = inlined_call_operand.hbm [shape: f32[128,128], index: 1, kind: input, shape index: {}]   ;;  %s334_s2 = inlined_call_operand.vmem [shape: f32[1,128], index: 2, kind: input, shape index: {}]   ;;  %s335_s3 = inlined_call_operand.hbm [shape: f32[128,128], index: 3, kind: input, shape index: {}]   ;;  %s336_s4 = inlined_call_operand.vmem [shape: f32[1,128], index: 4, kind: input, shape index: {}]   ;;  %s337_s5 = inlined_call_operand.hbm [shape: f32[8,128], index: 5, kind: output, shape index: {}]  }
   0x1   :  { %11 = vsyncpa [#allocation6], 0  ;;  %s28_s20 = sshll.u32 %s333_s1, 4  ;;  %s29_s20 = int_to_ptr.hbm [resolvable:$true] %s28_s20 }
   0x2   :  { %12 = vsyncpa [#allocation4], 0  ;;  %s278_s21 = smov [#allocation5]   ;;  %s18_s25 = sshll.u32 %s332_s0, 4  ;;  %s19_s25 = int_to_ptr.hbm [resolvable:$true] %s18_s25 }
   0x3   :  { %s30_s22 = sshll.u32 %s278_s21, 4  ;;  %s279_s26 = smov 128   ;;  %s31_s22 = int_to_ptr.vmem [resolvable:$true] %s30_s22 }
   0x4   :  { %s280_s27 = smov 8   ;;  %s281_s28 = smov [#allocation2]  }
   0x5   :  { %36 = dma.hbm_to_vmem [thread:$0]  %s29_s20, 2048, %s31_s22, [#allocation6], %s279_s26, %s279_s26, %s280_s27  }
   0x6   :  { %s20_s29 = sshll.u32 %s281_s28, 4  ;;  %s43_s7 = sshll.u32 %s335_s3, 4  ;;  %s21_s29 = int_to_ptr.vmem [resolvable:$true] %s20_s29  ;;  %s44_s7 = int_to_ptr.hbm [resolvable:$true] %s43_s7 }
   0x7   :  { %23 = dma.hbm_to_vmem [thread:$0]  %s19_s25, 128, %s21_s29, [#allocation3]  }
   0x8   :  { %s282_s1 = smov [#allocation7]  }
   0x9   :  { %s45_s8 = sshll.u32 %s282_s1, 4  ;;  %s46_s8 = int_to_ptr.vmem [resolvable:$true] %s45_s8 }
   0xa   :  { %51 = dma.hbm_to_vmem [thread:$0]  %s44_s7, 2048, %s46_s8, [#allocation6], %s279_s26, %s279_s26, %s280_s27  }
   0xb   :  { %272 = dma.done.wait [#allocation3], 128  }
   0xc   :  { %273 = vsyncadd [#allocation3], 4294967168 }
   0xd   :  { %274 = dma.done.wait [#allocation6], 4096  }
   0xe   :  { %275 = vsyncadd [#allocation6], 4294963200  ;;  %v82_v0 = vld [vmem:[#allocation5 + $0x78] sm:$0xff]  ;;  %v81_v1 = vld [vmem:[#allocation5 + $0x70] sm:$0xff]  ;;  %s283_s11 = smov [#allocation8]   ;;  %s157_s15 = sshll.u32 %s337_s5, 4  ;;  %s158_s15 = int_to_ptr.hbm [resolvable:$true] %s157_s15 }
   0xf   :  { %87 = vmatpush.msra.mxu0 %v82_v0  ;;  %v80_v2 = vld [vmem:[#allocation5 + $0x68] sm:$0xff]  ;;  %v79_v3 = vld [vmem:[#allocation5 + $0x60] sm:$0xff]  ;;  %v123_v4 = vld [vmem:[#allocation7 + $0x78] sm:$0xff]  ;;  %s155_s12 = sshll.u32 %s283_s11, 4  ;;  %s156_s12 = int_to_ptr.vmem [resolvable:$true] %s155_s12 }
  0x10   :  { %v78_v5 = vld [vmem:[#allocation5 + $0x58] sm:$0xff]  ;;  %128 = vmatpush.msra.mxu1 %v123_v4  ;;  %v122_v6 = vld [vmem:[#allocation7 + $0x70] sm:$0xff]  ;;  %v121_v7 = vld [vmem:[#allocation7 + $0x68] sm:$0xff] }
  0x11   :  { %88 = vmatpush.msra.mxu0 %v81_v1  ;;  %v77_v8 = vld [vmem:[#allocation5 + $0x50] sm:$0xff]  ;;  %v120_v9 = vld [vmem:[#allocation7 + $0x60] sm:$0xff]  ;;  %v76_v10 = vld [vmem:[#allocation5 + $0x48] sm:$0xff] }
  0x12   :  { %129 = vmatpush.msra.mxu1 %v122_v6  ;;  %v119_v11 = vld [vmem:[#allocation7 + $0x58] sm:$0xff]  ;;  %v75_v12 = vld [vmem:[#allocation5 + $0x40] sm:$0xff]  ;;  %v118_v13 = vld [vmem:[#allocation7 + $0x50] sm:$0xff] }
  0x13   :  { %89 = vmatpush.msra.mxu0 %v80_v2  ;;  %v74_v14 = vld [vmem:[#allocation5 + $0x38] sm:$0xff]  ;;  %v117_v15 = vld [vmem:[#allocation7 + $0x48] sm:$0xff]  ;;  %v73_v16 = vld [vmem:[#allocation5 + $0x30] sm:$0xff] }
  0x14   :  { %130 = vmatpush.msra.mxu1 %v121_v7  ;;  %v116_v17 = vld [vmem:[#allocation7 + $0x40] sm:$0xff]  ;;  %v72_v18 = vld [vmem:[#allocation5 + $0x28] sm:$0xff]  ;;  %v115_v19 = vld [vmem:[#allocation7 + $0x38] sm:$0xff] }
  0x15   :  { %90 = vmatpush.msra.mxu0 %v79_v3  ;;  %v71_v20 = vld [vmem:[#allocation5 + $0x20] sm:$0xff]  ;;  %v114_v21 = vld [vmem:[#allocation7 + $0x30] sm:$0xff]  ;;  %v70_v22 = vld [vmem:[#allocation5 + $0x18] sm:$0xff] }
  0x16   :  { %131 = vmatpush.msra.mxu1 %v120_v9  ;;  %v113_v23 = vld [vmem:[#allocation7 + $0x28] sm:$0xff]  ;;  %v69_v24 = vld [vmem:[#allocation5 + $0x10] sm:$0xff]  ;;  %v112_v25 = vld [vmem:[#allocation7 + $0x20] sm:$0xff] }
  0x17   :  { %91 = vmatpush.msra.mxu0 %v78_v5  ;;  %v68_v26 = vld [vmem:[#allocation5 + $0x8] sm:$0xff]  ;;  %v111_v27 = vld [vmem:[#allocation7 + $0x18] sm:$0xff]  ;;  %v67_v28 = vld [vmem:[#allocation5] sm:$0xff] }
  0x18   :  { %132 = vmatpush.msra.mxu1 %v119_v11  ;;  %v66_v29 = vld [vmem:[#allocation2] sm:$0xff]  ;;  %v110_v30 = vld [vmem:[#allocation7 + $0x10] sm:$0xff]  ;;  %v109_v31 = vld [vmem:[#allocation7 + $0x8] sm:$0xff] }
  0x19   :  { %92 = vmatpush.msra.mxu0 %v77_v8  ;;  %v108_v32 = vld [vmem:[#allocation7] sm:$0xff]  ;;  %v174_v33 = vld [vmem:[%s334_s2] ss:$0 sm:$0xff] }
  0x1a   :  { %133 = vmatpush.msra.mxu1 %v118_v13  ;;  %v175_v37 = vld [vmem:[%s336_s4] ss:$0 sm:$0xff] }
  0x1b   :  { %93 = vmatpush.msra.mxu0 %v76_v10 }
  0x1c   :  { %134 = vmatpush.msra.mxu1 %v117_v15 }
  0x1d   :  { %94 = vmatpush.msra.mxu0 %v75_v12 }
  0x1e   :  { %135 = vmatpush.msra.mxu1 %v116_v17 }
  0x1f   :  { %95 = vmatpush.msra.mxu0 %v74_v14 }
  0x20   :  { %136 = vmatpush.msra.mxu1 %v115_v19 }
  0x21   :  { %96 = vmatpush.msra.mxu0 %v73_v16 }
  0x22   :  { %137 = vmatpush.msra.mxu1 %v114_v21 }
  0x23   :  { %97 = vmatpush.msra.mxu0 %v72_v18 }
  0x24   :  { %138 = vmatpush.msra.mxu1 %v113_v23 }
  0x25   :  { %98 = vmatpush.msra.mxu0 %v71_v20 }
  0x26   :  { %139 = vmatpush.msra.mxu1 %v112_v25 }
  0x27   :  { %99 = vmatpush.msra.mxu0 %v70_v22 }
  0x28   :  { %140 = vmatpush.msra.mxu1 %v111_v27 }
  0x29   :  { %100 = vmatpush.msra.mxu0 %v69_v24 }
  0x2a   :  { %141 = vmatpush.msra.mxu1 %v110_v30 }
  0x2b   :  { %101 = vmatpush.msra.mxu0 %v68_v26 }
  0x2c   :  { %142 = vmatpush.msra.mxu1 %v109_v31 }
  0x2d   :  { %102 = vmatpush.msra.mxu0 %v67_v28 }
  0x2e   :  { %103 = vmatmul.f32.vlgmr.msra.gmra.mxu0 %v66_v29  ;;  %143 = vmatpush.msra.mxu1 %v108_v32 }
  0xab   :  { %v104_v34 = vpop.f32.mrf.mxu0 }
  0xac   :  { %v105_v35 = vadd.f32 %v174_v33, %v104_v34 }
  0xae   :  { %v107_v36 = vmax.f32 %v105_v35, 0.0 }
  0xb0   :  { %144 = vmatmul.f32.vlgmr.msra.gmra.mxu1 %v107_v36 }
 0x12d   :  { %v145_v38 = vpop.f32.mrf.mxu1 }
 0x12e   :  { %v146_v39 = vadd.f32 %v175_v37, %v145_v38 }
 0x130   :  { %v148_v40 = vmax.f32 %v146_v39, 0.0 }
 0x132   :  { %149 = vst [vmem:[#allocation8] sm:$0xff] %v148_v40 }
 0x133   :  { %160 = dma.vmem_to_hbm [thread:$0]  %s156_s12, 128, %s158_s15, [#allocation4]  }
 0x134   :  { %276 = dma.done.wait [#allocation4], 128  }
 0x135   :  { %277 = vsyncadd [#allocation4], 4294967168 }
 0x136   :  { %165 = vsyncpa [#allocation3], 1 }
 0x137   :  { %166 = vsyncpa [#allocation6], 1 }
 0x138   :  { %167 = vsyncpa [#allocation4], 1 }

// kernel: tpu_custom_call.1
= control target key start
LH: loop header
LB: loop body
LE: loop exit
PB: predicated region body
PF: predicated region fallthrough
CT: control target
= control target key end

     0   :  { %10 = vsyncpa [#allocation3], 0  ;;  %s332_s0 = inlined_call_operand.hbm [shape: f32[8,128], index: 0, kind: input, shape index: {}]   ;;  %s333_s1 = inlined_call_operand.hbm [shape: f32[128,128], index: 1, kind: input, shape index: {}]   ;;  %s334_s2 = inlined_call_operand.vmem [shape: f32[1,128], index: 2, kind: input, shape index: {}]   ;;  %s335_s3 = inlined_call_operand.hbm [shape: f32[128,128], index: 3, kind: input, shape index: {}]   ;;  %s336_s4 = inlined_call_operand.vmem [shape: f32[1,128], index: 4, kind: input, shape index: {}]   ;;  %s337_s5 = inlined_call_operand.hbm [shape: f32[8,128], index: 5, kind: output, shape index: {}]  }
   0x1   :  { %11 = vsyncpa [#allocation6], 0  ;;  %s28_s20 = sshll.u32 %s333_s1, 4  ;;  %s29_s20 = int_to_ptr.hbm [resolvable:$true] %s28_s20 }
   0x2   :  { %12 = vsyncpa [#allocation4], 0  ;;  %s278_s21 = smov [#allocation5]   ;;  %s18_s25 = sshll.u32 %s332_s0, 4  ;;  %s19_s25 = int_to_ptr.hbm [resolvable:$true] %s18_s25 }
   0x3   :  { %s30_s22 = sshll.u32 %s278_s21, 4  ;;  %s279_s26 = smov 128   ;;  %s31_s22 = int_to_ptr.vmem [resolvable:$true] %s30_s22 }
   0x4   :  { %s280_s27 = smov 8   ;;  %s281_s28 = smov [#allocation2]  }
   0x5   :  { %36 = dma.hbm_to_vmem [thread:$0]  %s29_s20, 2048, %s31_s22, [#allocation6], %s279_s26, %s279_s26, %s280_s27  }
   0x6   :  { %s20_s29 = sshll.u32 %s281_s28, 4  ;;  %s43_s7 = sshll.u32 %s335_s3, 4  ;;  %s21_s29 = int_to_ptr.vmem [resolvable:$true] %s20_s29  ;;  %s44_s7 = int_to_ptr.hbm [resolvable:$true] %s43_s7 }
   0x7   :  { %23 = dma.hbm_to_vmem [thread:$0]  %s19_s25, 128, %s21_s29, [#allocation3]  }
   0x8   :  { %s282_s1 = smov [#allocation7]  }
   0x9   :  { %s45_s8 = sshll.u32 %s282_s1, 4  ;;  %s46_s8 = int_to_ptr.vmem [resolvable:$true] %s45_s8 }
   0xa   :  { %51 = dma.hbm_to_vmem [thread:$0]  %s44_s7, 2048, %s46_s8, [#allocation6], %s279_s26, %s279_s26, %s280_s27  }
   0xb   :  { %272 = dma.done.wait [#allocation3], 128  }
   0xc   :  { %273 = vsyncadd [#allocation3], 4294967168 }
   0xd   :  { %274 = dma.done.wait [#allocation6], 4096  }
   0xe   :  { %275 = vsyncadd [#allocation6], 4294963200  ;;  %v82_v0 = vld [vmem:[#allocation5 + $0x78] sm:$0xff]  ;;  %v81_v1 = vld [vmem:[#allocation5 + $0x70] sm:$0xff]  ;;  %s283_s11 = smov [#allocation8]   ;;  %s157_s15 = sshll.u32 %s337_s5, 4  ;;  %s158_s15 = int_to_ptr.hbm [resolvable:$true] %s157_s15 }
   0xf   :  { %87 = vmatpush.msra.mxu0 %v82_v0  ;;  %v80_v2 = vld [vmem:[#allocation5 + $0x68] sm:$0xff]  ;;  %v79_v3 = vld [vmem:[#allocation5 + $0x60] sm:$0xff]  ;;  %v123_v4 = vld [vmem:[#allocation7 + $0x78] sm:$0xff]  ;;  %s155_s12 = sshll.u32 %s283_s11, 4  ;;  %s156_s12 = int_to_ptr.vmem [resolvable:$true] %s155_s12 }
  0x10   :  { %v78_v5 = vld [vmem:[#allocation5 + $0x58] sm:$0xff]  ;;  %128 = vmatpush.msra.mxu1 %v123_v4  ;;  %v122_v6 = vld [vmem:[#allocation7 + $0x70] sm:$0xff]  ;;  %v121_v7 = vld [vmem:[#allocation7 + $0x68] sm:$0xff] }
  0x11   :  { %88 = vmatpush.msra.mxu0 %v81_v1  ;;  %v77_v8 = vld [vmem:[#allocation5 + $0x50] sm:$0xff]  ;;  %v120_v9 = vld [vmem:[#allocation7 + $0x60] sm:$0xff]  ;;  %v76_v10 = vld [vmem:[#allocation5 + $0x48] sm:$0xff] }
  0x12   :  { %129 = vmatpush.msra.mxu1 %v122_v6  ;;  %v119_v11 = vld [vmem:[#allocation7 + $0x58] sm:$0xff]  ;;  %v75_v12 = vld [vmem:[#allocation5 + $0x40] sm:$0xff]  ;;  %v118_v13 = vld [vmem:[#allocation7 + $0x50] sm:$0xff] }
  0x13   :  { %89 = vmatpush.msra.mxu0 %v80_v2  ;;  %v74_v14 = vld [vmem:[#allocation5 + $0x38] sm:$0xff]  ;;  %v117_v15 = vld [vmem:[#allocation7 + $0x48] sm:$0xff]  ;;  %v73_v16 = vld [vmem:[#allocation5 + $0x30] sm:$0xff] }
  0x14   :  { %130 = vmatpush.msra.mxu1 %v121_v7  ;;  %v116_v17 = vld [vmem:[#allocation7 + $0x40] sm:$0xff]  ;;  %v72_v18 = vld [vmem:[#allocation5 + $0x28] sm:$0xff]  ;;  %v115_v19 = vld [vmem:[#allocation7 + $0x38] sm:$0xff] }
  0x15   :  { %90 = vmatpush.msra.mxu0 %v79_v3  ;;  %v71_v20 = vld [vmem:[#allocation5 + $0x20] sm:$0xff]  ;;  %v114_v21 = vld [vmem:[#allocation7 + $0x30] sm:$0xff]  ;;  %v70_v22 = vld [vmem:[#allocation5 + $0x18] sm:$0xff] }
  0x16   :  { %131 = vmatpush.msra.mxu1 %v120_v9  ;;  %v113_v23 = vld [vmem:[#allocation7 + $0x28] sm:$0xff]  ;;  %v69_v24 = vld [vmem:[#allocation5 + $0x10] sm:$0xff]  ;;  %v112_v25 = vld [vmem:[#allocation7 + $0x20] sm:$0xff] }
  0x17   :  { %91 = vmatpush.msra.mxu0 %v78_v5  ;;  %v68_v26 = vld [vmem:[#allocation5 + $0x8] sm:$0xff]  ;;  %v111_v27 = vld [vmem:[#allocation7 + $0x18] sm:$0xff]  ;;  %v67_v28 = vld [vmem:[#allocation5] sm:$0xff] }
  0x18   :  { %132 = vmatpush.msra.mxu1 %v119_v11  ;;  %v66_v29 = vld [vmem:[#allocation2] sm:$0xff]  ;;  %v110_v30 = vld [vmem:[#allocation7 + $0x10] sm:$0xff]  ;;  %v109_v31 = vld [vmem:[#allocation7 + $0x8] sm:$0xff] }
  0x19   :  { %92 = vmatpush.msra.mxu0 %v77_v8  ;;  %v108_v32 = vld [vmem:[#allocation7] sm:$0xff]  ;;  %v174_v33 = vld [vmem:[%s334_s2] ss:$0 sm:$0xff] }
  0x1a   :  { %133 = vmatpush.msra.mxu1 %v118_v13  ;;  %v175_v37 = vld [vmem:[%s336_s4] ss:$0 sm:$0xff] }
  0x1b   :  { %93 = vmatpush.msra.mxu0 %v76_v10 }
  0x1c   :  { %134 = vmatpush.msra.mxu1 %v117_v15 }
  0x1d   :  { %94 = vmatpush.msra.mxu0 %v75_v12 }
  0x1e   :  { %135 = vmatpush.msra.mxu1 %v116_v17 }
  0x1f   :  { %95 = vmatpush.msra.mxu0 %v74_v14 }
  0x20   :  { %136 = vmatpush.msra.mxu1 %v115_v19 }
  0x21   :  { %96 = vmatpush.msra.mxu0 %v73_v16 }
  0x22   :  { %137 = vmatpush.msra.mxu1 %v114_v21 }
  0x23   :  { %97 = vmatpush.msra.mxu0 %v72_v18 }
  0x24   :  { %138 = vmatpush.msra.mxu1 %v113_v23 }
  0x25   :  { %98 = vmatpush.msra.mxu0 %v71_v20 }
  0x26   :  { %139 = vmatpush.msra.mxu1 %v112_v25 }
  0x27   :  { %99 = vmatpush.msra.mxu0 %v70_v22 }
  0x28   :  { %140 = vmatpush.msra.mxu1 %v111_v27 }
  0x29   :  { %100 = vmatpush.msra.mxu0 %v69_v24 }
  0x2a   :  { %141 = vmatpush.msra.mxu1 %v110_v30 }
  0x2b   :  { %101 = vmatpush.msra.mxu0 %v68_v26 }
  0x2c   :  { %142 = vmatpush.msra.mxu1 %v109_v31 }
  0x2d   :  { %102 = vmatpush.msra.mxu0 %v67_v28 }
  0x2e   :  { %103 = vmatmul.f32.vlgmr.msra.gmra.mxu0 %v66_v29  ;;  %143 = vmatpush.msra.mxu1 %v108_v32 }
  0xab   :  { %v104_v34 = vpop.f32.mrf.mxu0 }
  0xac   :  { %v105_v35 = vadd.f32 %v174_v33, %v104_v34 }
  0xae   :  { %v107_v36 = vmax.f32 %v105_v35, 0.0 }
  0xb0   :  { %144 = vmatmul.f32.vlgmr.msra.gmra.mxu1 %v107_v36 }
 0x12d   :  { %v145_v38 = vpop.f32.mrf.mxu1 }
 0x12e   :  { %v146_v39 = vadd.f32 %v175_v37, %v145_v38 }
 0x130   :  { %v148_v40 = vmax.f32 %v146_v39, 0.0 }
 0x132   :  { %149 = vst [vmem:[#allocation8] sm:$0xff] %v148_v40 }
 0x133   :  { %160 = dma.vmem_to_hbm [thread:$0]  %s156_s12, 128, %s158_s15, [#allocation4]  }
 0x134   :  { %276 = dma.done.wait [#allocation4], 128  }
 0x135   :  { %277 = vsyncadd [#allocation4], 4294967168 }
 0x136   :  { %165 = vsyncpa [#allocation3], 1 }
 0x137   :  { %166 = vsyncpa [#allocation6], 1 }
 0x138   :  { %167 = vsyncpa [#allocation4], 1 }

</bundles_post_ra>
